<compile_context>
chip_gen: v6e
topology: v6e:2x2x1
jax: 0.10.0
libtpu: 0.0.40
codegen_flags: <defaults>
</compile_context>

<pallas_src>
import functools

import jax
import jax.numpy as jnp
from jax import lax
from jax.experimental import pallas as pl
from jax.experimental.pallas import tpu as pltpu

EPS = 1e-5
LANE = 128


def _round_up(x, m):
    return (x + m - 1) // m * m


def _im2col(x, kh, kw, stride, padding, dilation):
    """NCHW -> [N*OH*OW, C*KH*KW], channel-major (matches weight.reshape(OC,-1))."""
    n, c, h, w = x.shape
    xp = jnp.pad(x, ((0, 0), (0, 0), (padding, padding), (padding, padding)))
    oh = (h + 2 * padding - dilation * (kh - 1) - 1) // stride + 1
    ow = (w + 2 * padding - dilation * (kw - 1) - 1) // stride + 1
    cols = []
    for i in range(kh):
        for j in range(kw):
            patch = xp[:, :,
                       i * dilation: i * dilation + stride * oh: stride,
                       j * dilation: j * dilation + stride * ow: stride]  # [N,C,OH,OW]
            cols.append(patch)
    cols = jnp.stack(cols, axis=2)                 # [N, C, KH*KW, OH, OW]
    cols = cols.transpose(0, 3, 4, 1, 2)           # [N, OH, OW, C, KH*KW]
    return cols.reshape(n * oh * ow, c * kh * kw), oh, ow


def _conv_stats_kernel(p_ref, w_ref, y_ref, sum_ref, sumsq_ref):
    """One M-tile: bf16 MXU matmul (f32 acc) + per-tile BN partial sums."""
    y = jnp.dot(p_ref[...], w_ref[...], preferred_element_type=jnp.float32)  # [TM, OCp]
    y_ref[...] = y
    # Single-pass statistics: sum and sum-of-squares (var = E[y^2] - E[y]^2).
    s1 = jnp.sum(y, axis=0, keepdims=True)          # [1, OCp]
    s2 = jnp.sum(y * y, axis=0, keepdims=True)      # [1, OCp]
    ocp = y.shape[1]
    # Stats blocks are (1, 8, OCp) to satisfy the (8,128) tiling; broadcast
    # the per-channel row across the 8 sublanes (wrapper reads row 0).
    sum_ref[...] = jnp.broadcast_to(s1[None], (1, 8, ocp))
    sumsq_ref[...] = jnp.broadcast_to(s2[None], (1, 8, ocp))


def _bn_relu_kernel(y_ref, scale_ref, bias_ref, o_ref):
    """One M-tile: y * scale + bias, relu (scale/bias already fold BN)."""
    o_ref[...] = jnp.maximum(
        y_ref[...] * scale_ref[...] + bias_ref[...], 0.0).astype(o_ref.dtype)


@functools.partial(jax.jit, static_argnames=("stride", "padding", "dilation", "tm"))
def conv2d_with_bn_forward(x, weight, gamma, beta, *, stride, padding,
                           dilation=1, tm=512):
    # TODO(synk): groups > 1 not implemented (module default groups=1 used).
    n, c, h, w = x.shape
    oc, _, kh, kw = weight.shape

    # im2col produced once, in bf16 (halves HBM traffic of the patch matrix).
    patches, oh, ow = _im2col(x.astype(jnp.bfloat16), kh, kw, stride, padding, dilation)
    m, k = patches.shape

    # Lane-dense padding: K, OC -> multiples of 128; M -> multiple of TM.
    kp = _round_up(k, LANE)
    ocp = _round_up(oc, LANE)
    tm = _round_up(min(tm, m), 8)
    mp = _round_up(m, tm)
    m_tiles = mp // tm

    patches_p = jnp.zeros((mp, kp), jnp.bfloat16).at[:m, :k].set(patches)
    w2 = jnp.zeros((kp, ocp), jnp.bfloat16).at[:k, :oc].set(
        weight.reshape(oc, k).T.astype(jnp.bfloat16))

    cparams = pltpu.CompilerParams(
        dimension_semantics=("parallel",),
        vmem_limit_bytes=32 * 1024 * 1024,
    )

    # ---- Pass 1: tiled conv matmul + per-tile BN partial statistics. ----
    y, sum_stats, sumsq_stats = pl.pallas_call(
        _conv_stats_kernel,
        grid=(m_tiles,),
        in_specs=[
            pl.BlockSpec((tm, kp), lambda i: (i, 0)),
            pl.BlockSpec((kp, ocp), lambda i: (0, 0)),
        ],
        out_specs=[
            pl.BlockSpec((tm, ocp), lambda i: (i, 0)),
            pl.BlockSpec((1, 8, ocp), lambda i: (i, 0, 0)),
            pl.BlockSpec((1, 8, ocp), lambda i: (i, 0, 0)),
        ],
        out_shape=[
            jax.ShapeDtypeStruct((mp, ocp), jnp.float32),
            jax.ShapeDtypeStruct((m_tiles, 8, ocp), jnp.float32),
            jax.ShapeDtypeStruct((m_tiles, 8, ocp), jnp.float32),
        ],
        compiler_params=cparams,
        cost_estimate=pl.CostEstimate(
            flops=2 * mp * kp * ocp,
            transcendentals=0,
            bytes_accessed=mp * kp * 2 + kp * ocp * 2 + mp * ocp * 4),
    )(patches_p, w2)

    # ---- Global BN statistics (training-mode, biased variance over N*OH*OW).
    # Zero-padded M rows / K cols contribute exactly zero, so divide by real M.
    ssum = jnp.sum(sum_stats[:, 0, :], axis=0)        # [OCp]
    ssq = jnp.sum(sumsq_stats[:, 0, :], axis=0)       # [OCp]
    mean = ssum / m
    var = jnp.maximum(ssq / m - mean * mean, 0.0)
    gamma_p = jnp.zeros((ocp,), jnp.float32).at[:oc].set(gamma.astype(jnp.float32))
    beta_p = jnp.zeros((ocp,), jnp.float32).at[:oc].set(beta.astype(jnp.float32))
    scale = gamma_p * lax.rsqrt(var + EPS)            # fold gamma/rsqrt
    bias = beta_p - mean * scale

    # ---- Pass 2: tiled normalize (one FMA) + relu. ----
    out = pl.pallas_call(
        _bn_relu_kernel,
        grid=(m_tiles,),
        in_specs=[
            pl.BlockSpec((tm, ocp), lambda i: (i, 0)),
            pl.BlockSpec((1, ocp), lambda i: (0, 0)),
            pl.BlockSpec((1, ocp), lambda i: (0, 0)),
        ],
        out_specs=pl.BlockSpec((tm, ocp), lambda i: (i, 0)),
        out_shape=jax.ShapeDtypeStruct((mp, ocp), jnp.float32),
        compiler_params=cparams,
        cost_estimate=pl.CostEstimate(
            flops=3 * mp * ocp,
            transcendentals=0,
            bytes_accessed=2 * mp * ocp * 4 + 2 * ocp * 4),
    )(y, scale.reshape(1, ocp), bias.reshape(1, ocp))

    # [M, OC] -> [N, OH, OW, OC] -> NCHW (module I/O is NCHW).
    # NOTE: downstream consumers that accept NHWC can skip this transpose.
    return out[:m, :oc].reshape(n, oh, ow, oc).transpose(0, 3, 1, 2)


def _reference(x, weight, gamma, beta, *, stride, padding, dilation=1):
    # Same numerics as the kernel: bf16 operands, f32 accumulation, f32 BN.
    conv = lax.conv_general_dilated(
        x.astype(jnp.bfloat16), weight.astype(jnp.bfloat16),
        window_strides=(stride, stride),
        padding=((padding, padding), (padding, padding)),
        rhs_dilation=(dilation, dilation),
        dimension_numbers=("NCHW", "OIHW", "NCHW"),
        preferred_element_type=jnp.float32)
    mean = conv.mean(axis=(0, 2, 3), keepdims=True)
    var = conv.var(axis=(0, 2, 3), keepdims=True)
    y = (conv - mean) * lax.rsqrt(var + EPS)
    y = y * gamma.reshape(1, -1, 1, 1) + beta.reshape(1, -1, 1, 1)
    return jnp.maximum(y, 0.0)


if __name__ == "__main__":
    # Module config (bias=False, groups=1 per defaults)
    in_channels, out_channels = 4, 8
    kernel_size, stride, padding, dilation = 3, 1, 1, 1

    key = jax.random.PRNGKey(0)
    kx, kw, kg, kb = jax.random.split(key, 4)
    x = jax.random.normal(kx, (2, in_channels, 16, 16), dtype=jnp.float32)
    weight = jax.random.normal(
        kw, (out_channels, in_channels, kernel_size, kernel_size),
        dtype=jnp.float32) * 0.1
    gamma = 1.0 + 0.1 * jax.random.normal(kg, (out_channels,), dtype=jnp.float32)
    beta = 0.1 * jax.random.normal(kb, (out_channels,), dtype=jnp.float32)

    # tm=128 -> 4-step grid on this small test shape (exercises the tiled
    # multi-block path and the cross-tile BN statistics combine).
    out = conv2d_with_bn_forward(x, weight, gamma, beta,
                                 stride=stride, padding=padding,
                                 dilation=dilation, tm=128)
    out = jax.block_until_ready(out)

    ref = _reference(x, weight, gamma, beta,
                     stride=stride, padding=padding, dilation=dilation)
    assert out.shape == ref.shape == (2, out_channels, 16, 16)
    assert jnp.max(jnp.abs(out - ref)) < 2e-3, "mismatch vs reference"

    print("KERNEL_OK")
</pallas_src>

<mosaic_0001>
module attributes {stable_mosaic.version = 11 : i64} {
  func.func @_conv_stats_kernel(%arg0: i32, %arg1: memref<128x128xbf16, #tpu.memory_space<vmem>>, %arg2: memref<128x128xbf16, #tpu.memory_space<vmem>>, %arg3: memref<128x128xf32, #tpu.memory_space<vmem>>, %arg4: memref<1x8x128xf32, #tpu.memory_space<vmem>>, %arg5: memref<1x8x128xf32, #tpu.memory_space<vmem>>) attributes {dimension_semantics = [#tpu.dimension_semantics<parallel>], iteration_bounds = array<i64: 4>, scalar_prefetch = 0 : i64, scratch_operands = 0 : i64, tpu.core_type = #tpu.core_type<tc>, window_params = [{transform_indices = @transform_0, window_bounds = array<i64: 128, 128>}, {pipeline_mode = #tpu.pipeline_mode<synchronous>, transform_indices = @transform_1, window_bounds = array<i64: 128, 128>}, {transform_indices = @transform_2, window_bounds = array<i64: 128, 128>}, {transform_indices = @transform_3, window_bounds = array<i64: 1, 8, 128>}, {transform_indices = @transform_4, window_bounds = array<i64: 1, 8, 128>}]} {
    %c0 = arith.constant 0 : index
    %c0_0 = arith.constant 0 : index
    %0 = vector.load %arg1[%c0, %c0_0] : memref<128x128xbf16, #tpu.memory_space<vmem>>, vector<128x128xbf16>
    %c0_1 = arith.constant 0 : index
    %c0_2 = arith.constant 0 : index
    %1 = vector.load %arg2[%c0_1, %c0_2] : memref<128x128xbf16, #tpu.memory_space<vmem>>, vector<128x128xbf16>
    %cst = arith.constant dense<0.000000e+00> : vector<128x128xf32>
    %2 = tpu.matmul %0, %1, %cst {dimension_numbers = #tpu.dot_dimension_numbers<[1], [0], [0], [1], [0, 0, 1, 1], [], []>} : vector<128x128xbf16>, vector<128x128xbf16>, vector<128x128xf32> -> vector<128x128xf32>
    %c0_3 = arith.constant 0 : index
    %c0_4 = arith.constant 0 : index
    %3 = vector.load %arg3[%c0_3, %c0_4] : memref<128x128xf32, #tpu.memory_space<vmem>>, vector<128x128xf32>
    tpu.vector_store %arg3[%c0_3, %c0_4], %2 {strides = array<i32>} : memref<128x128xf32, #tpu.memory_space<vmem>>, vector<128x128xf32>,
    %cst_5 = arith.constant dense<0.000000e+00> : vector<128xf32>
    %4 = vector.multi_reduction <add>, %2, %cst_5 [0] : vector<128x128xf32> to vector<128xf32>
    %5 = vector.shape_cast %4 : vector<128xf32> to vector<1x128xf32>
    %6 = arith.mulf %2, %2 : vector<128x128xf32>
    %cst_6 = arith.constant dense<0.000000e+00> : vector<128xf32>
    %7 = vector.multi_reduction <add>, %6, %cst_6 [0] : vector<128x128xf32> to vector<128xf32>
    %8 = vector.shape_cast %7 : vector<128xf32> to vector<1x128xf32>
    %9 = vector.shape_cast %5 : vector<1x128xf32> to vector<1x1x128xf32>
    %10 = vector.shape_cast %9 : vector<1x1x128xf32> to vector<1x1x128xf32>
    %11 = vector.broadcast %10 : vector<1x1x128xf32> to vector<1x8x128xf32>
    %c0_7 = arith.constant 0 : index
    %c0_8 = arith.constant 0 : index
    %c0_9 = arith.constant 0 : index
    %12 = vector.load %arg4[%c0_7, %c0_8, %c0_9] : memref<1x8x128xf32, #tpu.memory_space<vmem>>, vector<1x8x128xf32>
    tpu.vector_store %arg4[%c0_7, %c0_8, %c0_9], %11 {strides = array<i32>} : memref<1x8x128xf32, #tpu.memory_space<vmem>>, vector<1x8x128xf32>,
    %13 = vector.shape_cast %8 : vector<1x128xf32> to vector<1x1x128xf32>
    %14 = vector.shape_cast %13 : vector<1x1x128xf32> to vector<1x1x128xf32>
    %15 = vector.broadcast %14 : vector<1x1x128xf32> to vector<1x8x128xf32>
    %c0_10 = arith.constant 0 : index
    %c0_11 = arith.constant 0 : index
    %c0_12 = arith.constant 0 : index
    %16 = vector.load %arg5[%c0_10, %c0_11, %c0_12] : memref<1x8x128xf32, #tpu.memory_space<vmem>>, vector<1x8x128xf32>
    tpu.vector_store %arg5[%c0_10, %c0_11, %c0_12], %15 {strides = array<i32>} : memref<1x8x128xf32, #tpu.memory_space<vmem>>, vector<1x8x128xf32>,
    return
  }
  func.func @transform_0(%arg0: i32) -> (i32, i32) {
    %c0_i32 = arith.constant 0 : i32
    %c0_i32_0 = arith.constant 0 : i32
    return %arg0, %c0_i32 : i32, i32
  }
  func.func @transform_1(%arg0: i32) -> (i32, i32) {
    %c0_i32 = arith.constant 0 : i32
    %c0_i32_0 = arith.constant 0 : i32
    %c0_i32_1 = arith.constant 0 : i32
    return %c0_i32, %c0_i32_0 : i32, i32
  }
  func.func @transform_2(%arg0: i32) -> (i32, i32) {
    %c0_i32 = arith.constant 0 : i32
    %c0_i32_0 = arith.constant 0 : i32
    return %arg0, %c0_i32 : i32, i32
  }
  func.func @transform_3(%arg0: i32) -> (i32, i32, i32) {
    %c0_i32 = arith.constant 0 : i32
    %c0_i32_0 = arith.constant 0 : i32
    %c0_i32_1 = arith.constant 0 : i32
    return %arg0, %c0_i32, %c0_i32_0 : i32, i32, i32
  }
  func.func @transform_4(%arg0: i32) -> (i32, i32, i32) {
    %c0_i32 = arith.constant 0 : i32
    %c0_i32_0 = arith.constant 0 : i32
    %c0_i32_1 = arith.constant 0 : i32
    return %arg0, %c0_i32, %c0_i32_0 : i32, i32, i32
  }
}

module attributes {stable_mosaic.version = 11 : i64} {
  func.func @_bn_relu_kernel(%arg0: i32, %arg1: memref<128x128xf32, #tpu.memory_space<vmem>>, %arg2: memref<1x128xf32, #tpu.memory_space<vmem>>, %arg3: memref<1x128xf32, #tpu.memory_space<vmem>>, %arg4: memref<128x128xf32, #tpu.memory_space<vmem>>) attributes {dimension_semantics = [#tpu.dimension_semantics<parallel>], iteration_bounds = array<i64: 4>, scalar_prefetch = 0 : i64, scratch_operands = 0 : i64, tpu.core_type = #tpu.core_type<tc>, window_params = [{transform_indices = @transform_0, window_bounds = array<i64: 128, 128>}, {pipeline_mode = #tpu.pipeline_mode<synchronous>, transform_indices = @transform_1, window_bounds = array<i64: 1, 128>}, {pipeline_mode = #tpu.pipeline_mode<synchronous>, transform_indices = @transform_2, window_bounds = array<i64: 1, 128>}, {transform_indices = @transform_3, window_bounds = array<i64: 128, 128>}]} {
    %c0 = arith.constant 0 : index
    %c0_0 = arith.constant 0 : index
    %0 = vector.load %arg1[%c0, %c0_0] : memref<128x128xf32, #tpu.memory_space<vmem>>, vector<128x128xf32>
    %c0_1 = arith.constant 0 : index
    %c0_2 = arith.constant 0 : index
    %1 = vector.load %arg2[%c0_1, %c0_2] : memref<1x128xf32, #tpu.memory_space<vmem>>, vector<1x128xf32>
    %2 = vector.broadcast %1 : vector<1x128xf32> to vector<128x128xf32>
    %3 = arith.mulf %0, %2 : vector<128x128xf32>
    %c0_3 = arith.constant 0 : index
    %c0_4 = arith.constant 0 : index
    %4 = vector.load %arg3[%c0_3, %c0_4] : memref<1x128xf32, #tpu.memory_space<vmem>>, vector<1x128xf32>
    %5 = vector.broadcast %4 : vector<1x128xf32> to vector<128x128xf32>
    %6 = arith.addf %3, %5 : vector<128x128xf32>
    %cst = arith.constant 0.000000e+00 : f32
    %7 = vector.broadcast %cst : f32 to vector<128x128xf32>
    %8 = arith.maximumf %6, %7 : vector<128x128xf32>
    %c0_5 = arith.constant 0 : index
    %c0_6 = arith.constant 0 : index
    %9 = vector.load %arg4[%c0_5, %c0_6] : memref<128x128xf32, #tpu.memory_space<vmem>>, vector<128x128xf32>
    tpu.vector_store %arg4[%c0_5, %c0_6], %8 {strides = array<i32>} : memref<128x128xf32, #tpu.memory_space<vmem>>, vector<128x128xf32>,
    return
  }
  func.func @transform_0(%arg0: i32) -> (i32, i32) {
    %c0_i32 = arith.constant 0 : i32
    %c0_i32_0 = arith.constant 0 : i32
    return %arg0, %c0_i32 : i32, i32
  }
  func.func @transform_1(%arg0: i32) -> (i32, i32) {
    %c0_i32 = arith.constant 0 : i32
    %c0_i32_0 = arith.constant 0 : i32
    %c0_i32_1 = arith.constant 0 : i32
    return %c0_i32, %c0_i32_0 : i32, i32
  }
  func.func @transform_2(%arg0: i32) -> (i32, i32) {
    %c0_i32 = arith.constant 0 : i32
    %c0_i32_0 = arith.constant 0 : i32
    %c0_i32_1 = arith.constant 0 : i32
    return %c0_i32, %c0_i32_0 : i32, i32
  }
  func.func @transform_3(%arg0: i32) -> (i32, i32) {
    %c0_i32 = arith.constant 0 : i32
    %c0_i32_0 = arith.constant 0 : i32
    return %arg0, %c0_i32 : i32, i32
  }
}

</mosaic_0001>

<bundles_post_ra>
// kernel: conv2d_with_bn_forward.3
= control target key start
LH: loop header
LB: loop body
LE: loop exit
PB: predicated region body
PF: predicated region fallthrough
CT: control target
= control target key end

     0   :  { %s373_s12 = smov 0   ;;  %s468_s0 = inlined_call_operand.vmem [shape: f32[512,128], index: 0, kind: input, shape index: {}]   ;;  %s469_s1 = inlined_call_operand.vmem [shape: f32[1,128], index: 1, kind: input, shape index: {}]   ;;  %s470_s2 = inlined_call_operand.vmem [shape: f32[1,128], index: 2, kind: input, shape index: {}]   ;;  %s471_s3 = inlined_call_operand.vmem [shape: f32[512,128], index: 3, kind: output, shape index: {}]  }
   0x1 LB: > { %s324_s13 = sadd.s32 4294967295, %s351_s12   ;;  %p328_p0 = scmp.ge.s32.totalorder %s351_s12, 1  ;;  %s351_s12 = sphi %s373_s12, %s13_s12  }
   0x2   : > { %p138_p1 = scmp.lt.s32.totalorder %s351_s12, 5 }
   0x4   : > { %p139_p2 = pnand %p328_p0, %p138_p1 }
   0x5   : > { %s329_s14 = sshll.u32 (!%p139_p2), %s324_s13, 4 }
   0x6   : > { %142 = sbr.rel (%p139_p2) target bundleno = 32 (0x20), region = 32  ;;  %p163_p3 = scmp.lt.s32.totalorder (!%p139_p2), %s329_s14, 63 }
   0xb   : > { %s473_s14 = smov (!%p163_p3, %s329_s14), 63  ;;  %v384_v0 = vld [vmem:[%s469_s1] ss:$0 sm:$0xff] }
   0xc   : > { %s330_s15 = sshll.u32 %s473_s14, 3  ;;  %v394_v1 = vld [vmem:[%s470_s2] ss:$0 sm:$0xff] }
   0xd   : > { %s389_s20 = scalar_lea.vmem %s468_s0, %s330_s15  ;;  %s417_s25 = scalar_lea.vmem %s471_s3, %s330_s15 }
   0xe   : > { %v174_v2 = vld [vmem:[%s389_s20] sm:$0xff]  ;;  %v175_v3 = vld [vmem:[%s389_s20 + $0x8] sm:$0xff]  ;;  %v176_v4 = vld [vmem:[%s389_s20 + $0x10] sm:$0xff] }
   0xf   : > { %v197_v5 = vmul.f32 %v384_v0, %v174_v2  ;;  %v198_v6 = vmul.f32 %v384_v0, %v175_v3  ;;  %v199_v7 = vmul.f32 %v384_v0, %v176_v4  ;;  %v177_v8 = vld [vmem:[%s389_s20 + $0x18] sm:$0xff]  ;;  %v178_v9 = vld [vmem:[%s389_s20 + $0x20] sm:$0xff]  ;;  %v179_v10 = vld [vmem:[%s389_s20 + $0x28] sm:$0xff] }
  0x10   : > { %v200_v11 = vmul.f32 %v384_v0, %v177_v8  ;;  %v201_v12 = vmul.f32 %v384_v0, %v178_v9  ;;  %v202_v13 = vmul.f32 %v384_v0, %v179_v10  ;;  %v180_v14 = vld [vmem:[%s389_s20 + $0x30] sm:$0xff]  ;;  %v181_v15 = vld [vmem:[%s389_s20 + $0x38] sm:$0xff]  ;;  %v182_v24 = vld [vmem:[%s389_s20 + $0x40] sm:$0xff] }
  0x11   : > { %v220_v16 = vadd.f32 %v394_v1, %v197_v5  ;;  %v221_v17 = vadd.f32 %v394_v1, %v198_v6  ;;  %v222_v18 = vadd.f32 %v394_v1, %v199_v7  ;;  %v203_v19 = vmul.f32 %v384_v0, %v180_v14  ;;  %v183_v25 = vld [vmem:[%s389_s20 + $0x48] sm:$0xff]  ;;  %v184_v26 = vld [vmem:[%s389_s20 + $0x50] sm:$0xff]  ;;  %v185_v31 = vld [vmem:[%s389_s20 + $0x58] sm:$0xff] }
  0x12   : > { %v223_v20 = vadd.f32 %v394_v1, %v200_v11  ;;  %v224_v21 = vadd.f32 %v394_v1, %v201_v12  ;;  %v225_v22 = vadd.f32 %v394_v1, %v202_v13  ;;  %v204_v23 = vmul.f32 %v384_v0, %v181_v15  ;;  %v186_v32 = vld [vmem:[%s389_s20 + $0x60] sm:$0xff]  ;;  %v187_v33 = vld [vmem:[%s389_s20 + $0x68] sm:$0xff]  ;;  %v188_v38 = vld [vmem:[%s389_s20 + $0x70] sm:$0xff] }
  0x13   : > { %v236_v27 = vmax.f32 %v220_v16, 0.0  ;;  %v237_v28 = vmax.f32 %v221_v17, 0.0  ;;  %v238_v29 = vmax.f32 %v222_v18, 0.0  ;;  %v226_v30 = vadd.f32 %v394_v1, %v203_v19  ;;  %v189_v43 = vld [vmem:[%s389_s20 + $0x78] sm:$0xff] }
  0x14   : > { %v239_v34 = vmax.f32 %v223_v20, 0.0  ;;  %v240_v35 = vmax.f32 %v224_v21, 0.0  ;;  %v241_v36 = vmax.f32 %v225_v22, 0.0  ;;  %v227_v37 = vadd.f32 %v394_v1, %v204_v23 }
  0x15   : > { %252 = vst [vmem:[%s417_s25] sm:$0xff] %v236_v27  ;;  %253 = vst [vmem:[%s417_s25 + $0x8] sm:$0xff] %v237_v28  ;;  %v242_v39 = vmax.f32 %v226_v30, 0.0  ;;  %v205_v40 = vmul.f32 %v384_v0, %v182_v24  ;;  %v206_v41 = vmul.f32 %v384_v0, %v183_v25  ;;  %v207_v42 = vmul.f32 %v384_v0, %v184_v26 }
  0x16   : > { %254 = vst [vmem:[%s417_s25 + $0x10] sm:$0xff] %v238_v29  ;;  %255 = vst [vmem:[%s417_s25 + $0x18] sm:$0xff] %v239_v34  ;;  %v243_v44 = vmax.f32 %v227_v37, 0.0  ;;  %v208_v45 = vmul.f32 %v384_v0, %v185_v31  ;;  %v209_v46 = vmul.f32 %v384_v0, %v186_v32  ;;  %v210_v47 = vmul.f32 %v384_v0, %v187_v33 }
  0x17   : > { %256 = vst [vmem:[%s417_s25 + $0x20] sm:$0xff] %v240_v35  ;;  %257 = vst [vmem:[%s417_s25 + $0x28] sm:$0xff] %v241_v36  ;;  %v228_v48 = vadd.f32 %v394_v1, %v205_v40  ;;  %v229_v49 = vadd.f32 %v394_v1, %v206_v41  ;;  %v230_v50 = vadd.f32 %v394_v1, %v207_v42 }
  0x18   : > { %258 = vst [vmem:[%s417_s25 + $0x30] sm:$0xff] %v242_v39  ;;  %v211_v51 = vmul.f32 %v384_v0, %v188_v38  ;;  %259 = vst [vmem:[%s417_s25 + $0x38] sm:$0xff] %v243_v44  ;;  %v231_v52 = vadd.f32 %v394_v1, %v208_v45  ;;  %v232_v53 = vadd.f32 %v394_v1, %v209_v46 }
  0x19   : > { %v233_v54 = vadd.f32 %v394_v1, %v210_v47  ;;  %v212_v55 = vmul.f32 %v384_v0, %v189_v43  ;;  %v244_v56 = vmax.f32 %v228_v48, 0.0  ;;  %v245_v57 = vmax.f32 %v229_v49, 0.0 }
  0x1a   : > { %v246_v58 = vmax.f32 %v230_v50, 0.0  ;;  %v234_v59 = vadd.f32 %v394_v1, %v211_v51  ;;  %v247_v60 = vmax.f32 %v231_v52, 0.0  ;;  %v248_v61 = vmax.f32 %v232_v53, 0.0 }
  0x1b   : > { %v249_v62 = vmax.f32 %v233_v54, 0.0  ;;  %v235_v63 = vadd.f32 %v394_v1, %v212_v55  ;;  %260 = vst [vmem:[%s417_s25 + $0x40] sm:$0xff] %v244_v56  ;;  %261 = vst [vmem:[%s417_s25 + $0x48] sm:$0xff] %v245_v57 }
  0x1c   : > { %262 = vst [vmem:[%s417_s25 + $0x50] sm:$0xff] %v246_v58  ;;  %v250_v2 = vmax.f32 %v234_v59, 0.0  ;;  %263 = vst [vmem:[%s417_s25 + $0x58] sm:$0xff] %v247_v60 }
  0x1d   : > { %264 = vst [vmem:[%s417_s25 + $0x60] sm:$0xff] %v248_v61  ;;  %265 = vst [vmem:[%s417_s25 + $0x68] sm:$0xff] %v249_v62  ;;  %v251_v0 = vmax.f32 %v235_v63, 0.0 }
  0x1e   : > { %266 = vst [vmem:[%s417_s25 + $0x70] sm:$0xff] %v250_v2 }
  0x1f   : > { %267 = vst [vmem:[%s417_s25 + $0x78] sm:$0xff] %v251_v0 }
  0x20 PF: > { %s13_s12 = sadd.s32 1, %s351_s12  }
  0x21   : > { %p10_p4 = scmp.ge.s32.totalorder %s13_s12, 6  }
  0x23   :  { %12 = sbr.rel (!%p10_p4) target bundleno = 1 (0x1), region = 62 }

// kernel: conv2d_with_bn_forward.2
= control target key start
LH: loop header
LB: loop body
LE: loop exit
PB: predicated region body
PF: predicated region fallthrough
CT: control target
= control target key end

     0   :  { %s792_s15 = smov 0   ;;  %s876_s0 = inlined_call_operand.vmem [shape: bf16[512,128], index: 0, kind: input, shape index: {}]   ;;  %s877_s1 = inlined_call_operand.vmem [shape: bf16[128,128], index: 1, kind: input, shape index: {}]   ;;  %s878_s2 = inlined_call_operand.vmem [shape: f32[512,128], index: 2, kind: output, shape index: {0}]   ;;  %s879_s3 = inlined_call_operand.vmem [shape: f32[4,8,128], index: 3, kind: output, shape index: {1}]   ;;  %s880_s4 = inlined_call_operand.vmem [shape: f32[4,8,128], index: 4, kind: output, shape index: {2}]  }
   0x1 LB: > { %s798_s16 = sadd.s32 4294967295, %s765_s15   ;;  %p646_p0 = scmp.ge.s32.totalorder %s765_s15, 1  ;;  %s765_s15 = sphi %s792_s15, %s15_s15  }
   0x2   : > { %p168_p1 = scmp.lt.s32.totalorder %s765_s15, 5 }
   0x4   : > { %p169_p2 = pnand %p646_p0, %p168_p1 }
   0x5   : > { %s647_s19 = sshll.u32 (!%p169_p2), %s798_s16, 4  ;;  %p214_p4 = scmp.lt.s32.totalorder (!%p169_p2), %s798_s16, 3 }
   0x6   : > { %172 = sbr.rel (%p169_p2) target bundleno = 288 (0x120), region = 28  ;;  %p203_p3 = scmp.lt.s32.totalorder (!%p169_p2), %s647_s19, 63 }
   0xb   : > { %v743_v0 = vld [vmem:[%s877_s1 + $0x38] sm:$0xff]   ;;  %v744_v1 = vld [vmem:[%s877_s1 + $0x30] sm:$0xff]   ;;  %s882_s19 = smov (!%p203_p3, %s647_s19), 63  ;;  %v745_v2 = vld [vmem:[%s877_s1 + $0x28] sm:$0xff]   ;;  %s884_s16 = smov (!%p214_p4, %s798_s16), 3 }
   0xc   : > { %687 = vmatprep.subr.bf16.mxu0 %v743_v0  ;;  %719 = vmatprep.subr.bf16.mxu1 %v743_v0  ;;  %s648_s24 = sshll.u32 %s882_s19, 2  ;;  %v746_v3 = vld [vmem:[%s877_s1 + $0x20] sm:$0xff]   ;;  %v747_v5 = vld [vmem:[%s877_s1 + $0x18] sm:$0xff]   ;;  %v748_v7 = vld [vmem:[%s877_s1 + $0x10] sm:$0xff]   ;;  %s650_s12 = sshll.u32 %s882_s19, 3 }
   0xd   : > { %688 = vmatpush3.bf16.msra.mxu0 %v743_v0  ;;  %727 = vmatpush3.bf16.msra.mxu1 %v743_v0  ;;  %s818_s27 = scalar_lea.vmem %s876_s0, %s648_s24  ;;  %v749_v8 = vld [vmem:[%s877_s1 + $0x8] sm:$0xff]   ;;  %v750_v9 = vld [vmem:[%s877_s1] sm:$0xff]   ;;  %s847_s17 = scalar_lea.vmem %s878_s2, %s650_s12 }
   0xe   : > { %689 = vmatprep.subr.bf16.mxu0 %v744_v1  ;;  %720 = vmatprep.subr.bf16.mxu1 %v744_v1  ;;  %v751_v4 = vld [vmem:[%s818_s27] sm:$0xff]   ;;  %v752_v10 = vld [vmem:[%s818_s27 + $0x8] sm:$0xff]   ;;  %v753_v12 = vld [vmem:[%s818_s27 + $0x10] sm:$0xff]   ;;  %s651_s18 = sshll.u32 %s884_s16, 3 }
   0xf   : > { %703 = vmatprep.mubr.bf16.mxu0 %v751_v4  ;;  %v755_v6 = vld [vmem:[%s818_s27 + $0x20] sm:$0xff]   ;;  %v756_v11 = vld [vmem:[%s818_s27 + $0x28] sm:$0xff]   ;;  %v757_v13 = vld [vmem:[%s818_s27 + $0x30] sm:$0xff]   ;;  %s217_s21 = scalar_lea.vmem %s879_s3, %s651_s18  ;;  %s221_s24 = scalar_lea.vmem %s880_s4, %s651_s18 }
  0x10   : > { %711 = vmatprep.mubr.bf16.mxu1 %v755_v6  ;;  %v754_v14 = vld [vmem:[%s818_s27 + $0x18] sm:$0xff]  }
  0x11   : > { %690 = vmatpush3.bf16.msra.mxu0 %v744_v1  ;;  %728 = vmatpush3.bf16.msra.mxu1 %v744_v1  ;;  %v758_v15 = vld [vmem:[%s818_s27 + $0x38] sm:$0xff]  }
  0x12   : > { %691 = vmatprep.subr.bf16.mxu0 %v745_v2  ;;  %721 = vmatprep.subr.bf16.mxu1 %v745_v2 }
  0x15   : > { %692 = vmatpush3.bf16.msra.mxu0 %v745_v2  ;;  %729 = vmatpush3.bf16.msra.mxu1 %v745_v2 }
  0x16   : > { %693 = vmatprep.subr.bf16.mxu0 %v746_v3  ;;  %722 = vmatprep.subr.bf16.mxu1 %v746_v3 }
  0x19   : > { %694 = vmatpush3.bf16.msra.mxu0 %v746_v3  ;;  %730 = vmatpush3.bf16.msra.mxu1 %v746_v3 }
  0x1a   : > { %695 = vmatprep.subr.bf16.mxu0 %v747_v5  ;;  %723 = vmatprep.subr.bf16.mxu1 %v747_v5 }
  0x1d   : > { %696 = vmatpush3.bf16.msra.mxu0 %v747_v5  ;;  %731 = vmatpush3.bf16.msra.mxu1 %v747_v5 }
  0x1e   : > { %697 = vmatprep.subr.bf16.mxu0 %v748_v7  ;;  %724 = vmatprep.subr.bf16.mxu1 %v748_v7 }
  0x21   : > { %698 = vmatpush3.bf16.msra.mxu0 %v748_v7  ;;  %732 = vmatpush3.bf16.msra.mxu1 %v748_v7 }
  0x22   : > { %699 = vmatprep.subr.bf16.mxu0 %v749_v8  ;;  %725 = vmatprep.subr.bf16.mxu1 %v749_v8 }
  0x25   : > { %700 = vmatpush3.bf16.msra.mxu0 %v749_v8  ;;  %733 = vmatpush3.bf16.msra.mxu1 %v749_v8 }
  0x26   : > { %701 = vmatprep.subr.bf16.mxu0 %v750_v9  ;;  %726 = vmatprep.subr.bf16.mxu1 %v750_v9 }
  0x29   : > { %702 = vmatpush3.bf16.msra.mxu0 %v750_v9  ;;  %734 = vmatpush3.bf16.msra.mxu1 %v750_v9 }
  0x2c   : > { %704 = vmatmul.mubr.bf16.vlgmr.msra.gmra.mxu0 %v752_v10  ;;  %712 = vmatmul.mubr.bf16.vlgmr.msra.gmra.mxu1 %v756_v11 }
  0x2d   : > { %707 = vmatprep.mubr.bf16.mxu0 %v753_v12  ;;  %715 = vmatprep.mubr.bf16.mxu1 %v757_v13 }
  0x34   : > { %708 = vmatmul.mubr.bf16.gmra.mxu0 %v754_v14  ;;  %716 = vmatmul.mubr.bf16.gmra.mxu1 %v758_v15 }
  0xec   : > { %v705_v16 = vpop.f32.mrf.mxu0  ;;  %v713_v17 = vpop.f32.mrf.mxu1 }
  0xed   : > { %450 = vst [vmem:[%s847_s17 + $0x10] sm:$0xff] %v705_v16  ;;  %458 = vst [vmem:[%s847_s17 + $0x50] sm:$0xff] %v713_v17  ;;  %v487_v29 = vmul.f32 %v705_v16, %v705_v16  ;;  %v495_v59 = vmul.f32 %v713_v17, %v713_v17 }
  0xee   : > { %v385_v18 = vpop.f32.mrf.mxu0  ;;  %v417_v19 = vpop.f32.mrf.mxu1 }
  0xef   : > { %448 = vst [vmem:[%s847_s17] sm:$0xff] %v385_v18  ;;  %456 = vst [vmem:[%s847_s17 + $0x40] sm:$0xff] %v417_v19  ;;  %v485_v24 = vmul.f32 %v385_v18, %v385_v18  ;;  %v493_v53 = vmul.f32 %v417_v19, %v417_v19 }
  0xf0   : > { %v706_v20 = vpop.f32.mrf.mxu0  ;;  %v714_v21 = vpop.f32.mrf.mxu1 }
  0xf1   : > { %451 = vst [vmem:[%s847_s17 + $0x18] sm:$0xff] %v706_v20  ;;  %459 = vst [vmem:[%s847_s17 + $0x58] sm:$0xff] %v714_v21  ;;  %v488_v34 = vmul.f32 %v706_v20, %v706_v20  ;;  %v496_v62 = vmul.f32 %v714_v21, %v714_v21 }
  0xf2   : > { %v388_v22 = vpop.f32.mrf.mxu0  ;;  %v420_v23 = vpop.f32.mrf.mxu1 }
  0xf3   : > { %449 = vst [vmem:[%s847_s17 + $0x8] sm:$0xff] %v388_v22  ;;  %v464_v25 = vadd.f32 %v388_v22, %v385_v18  ;;  %v486_v26 = vmul.f32 %v388_v22, %v388_v22  ;;  %457 = vst [vmem:[%s847_s17 + $0x48] sm:$0xff] %v420_v23  ;;  %v494_v57 = vmul.f32 %v420_v23, %v420_v23 }
  0xf4   : > { %v709_v27 = vpop.f32.mrf.mxu0  ;;  %v717_v28 = vpop.f32.mrf.mxu1 }
  0xf5   : > { %v465_v30 = vadd.f32 %v705_v16, %v464_v25  ;;  %v501_v31 = vadd.f32 %v486_v26, %v485_v24  ;;  %454 = vst [vmem:[%s847_s17 + $0x30] sm:$0xff] %v709_v27  ;;  %462 = vst [vmem:[%s847_s17 + $0x70] sm:$0xff] %v717_v28  ;;  %v491_v47 = vmul.f32 %v709_v27, %v709_v27 }
  0xf6   : > { %v401_v32 = vpop.f32.mrf.mxu0  ;;  %v433_v33 = vpop.f32.mrf.mxu1  ;;  %v499_v7 = vmul.f32 %v717_v28, %v717_v28 }
  0xf7   : > { %v502_v35 = vadd.f32 %v501_v31, %v487_v29  ;;  %452 = vst [vmem:[%s847_s17 + $0x20] sm:$0xff] %v401_v32  ;;  %v466_v36 = vadd.f32 %v706_v20, %v465_v30  ;;  %460 = vst [vmem:[%s847_s17 + $0x60] sm:$0xff] %v433_v33  ;;  %v489_v40 = vmul.f32 %v401_v32, %v401_v32 }
  0xf8   : > { %v710_v37 = vpop.f32.mrf.mxu0  ;;  %v718_v38 = vpop.f32.mrf.mxu1  ;;  %v497_v2 = vmul.f32 %v433_v33, %v433_v33 }
  0xf9   : > { %v467_v39 = vadd.f32 %v466_v36, %v401_v32  ;;  %v503_v41 = vadd.f32 %v502_v35, %v488_v34  ;;  %455 = vst [vmem:[%s847_s17 + $0x38] sm:$0xff] %v710_v37  ;;  %463 = vst [vmem:[%s847_s17 + $0x78] sm:$0xff] %v718_v38  ;;  %v492_v50 = vmul.f32 %v710_v37, %v710_v37 }
  0xfa   : > { %v404_v42 = vpop.f32.mrf.mxu0  ;;  %v436_v43 = vpop.f32.mrf.mxu1  ;;  %v500_v10 = vmul.f32 %v718_v38, %v718_v38 }
  0xfb   : > { %v504_v44 = vadd.f32 %v503_v41, %v489_v40  ;;  %453 = vst [vmem:[%s847_s17 + $0x28] sm:$0xff] %v404_v42  ;;  %v468_v45 = vadd.f32 %v467_v39, %v404_v42  ;;  %v490_v46 = vmul.f32 %v404_v42, %v404_v42  ;;  %461 = vst [vmem:[%s847_s17 + $0x68] sm:$0xff] %v436_v43 }
  0xfc   : > { %v498_v6 = vmul.f32 %v436_v43, %v436_v43 }
  0xfd   : > { %v469_v48 = vadd.f32 %v709_v27, %v468_v45  ;;  %v505_v49 = vadd.f32 %v504_v44, %v490_v46 }
  0xff   : > { %v470_v51 = vadd.f32 %v710_v37, %v469_v48  ;;  %v506_v52 = vadd.f32 %v505_v49, %v491_v47 }
 0x101   : > { %v507_v54 = vadd.f32 %v506_v52, %v492_v50  ;;  %v471_v55 = vadd.f32 %v470_v51, %v417_v19 }
 0x103   : > { %v472_v56 = vadd.f32 %v471_v55, %v420_v23  ;;  %v508_v58 = vadd.f32 %v507_v54, %v493_v53 }
 0x105   : > { %v473_v60 = vadd.f32 %v713_v17, %v472_v56  ;;  %v509_v61 = vadd.f32 %v508_v58, %v494_v57 }
 0x107   : > { %v510_v63 = vadd.f32 %v509_v61, %v495_v59  ;;  %v474_v0 = vadd.f32 %v714_v21, %v473_v60 }
 0x109   : > { %v475_v1 = vadd.f32 %v474_v0, %v433_v33  ;;  %v511_v3 = vadd.f32 %v510_v63, %v496_v62 }
 0x10b   : > { %v512_v4 = vadd.f32 %v511_v3, %v497_v2  ;;  %v476_v5 = vadd.f32 %v475_v1, %v436_v43 }
 0x10d   : > { %v477_v8 = vadd.f32 %v717_v28, %v476_v5  ;;  %v513_v9 = vadd.f32 %v512_v4, %v498_v6 }
 0x10f   : > { %v478_v11 = vadd.f32 %v718_v38, %v477_v8  ;;  %v514_v12 = vadd.f32 %v513_v9, %v499_v7 }
 0x111   : > { %v479_v13 = vrot.slane %v478_v11, 4  ;;  %v515_v14 = vadd.f32 %v514_v12, %v500_v10 }
 0x113   : > { %v480_v15 = vadd.f32 %v479_v13, %v478_v11  ;;  %v516_v16 = vrot.slane %v515_v14, 4 }
 0x115   : > { %v481_v17 = vrot.slane %v480_v15, 2  ;;  %v517_v18 = vadd.f32 %v516_v16, %v515_v14 }
 0x117   : > { %v482_v19 = vadd.f32 %v481_v17, %v480_v15  ;;  %v518_v20 = vrot.slane %v517_v18, 2 }
 0x119   : > { %v483_v21 = vrot.slane %v482_v19, 1  ;;  %v519_v22 = vadd.f32 %v518_v20, %v517_v18 }
 0x11b   : > { %v484_v23 = vadd.f32 %v483_v21, %v482_v19  ;;  %v520_v24 = vrot.slane %v519_v22, 1 }
 0x11d   : > { %v521_v25 = vadd.f32 %v520_v24, %v519_v22  ;;  %522 = vst [vmem:[%s217_s21] sm:$0xff] %v484_v23 }
 0x11f   : > { %523 = vst [vmem:[%s221_s24] sm:$0xff] %v521_v25 }
 0x120 PF: > { %s15_s15 = sadd.s32 1, %s765_s15  }
 0x121   : > { %p12_p5 = scmp.ge.s32.totalorder %s15_s15, 6  }
 0x123   :  { %14 = sbr.rel (!%p12_p5) target bundleno = 1 (0x1), region = 82 }

</bundles_post_ra>
